<compile_context>
chip_gen: v7x
topology: tpu7x:2x2x1
jax: 0.10.0
libtpu: 0.0.40
codegen_flags: <defaults>
</compile_context>

<pallas_src>
import functools

import jax
import jax.numpy as jnp
from jax import lax
from jax.experimental import pallas as pl
from jax.experimental.pallas import tpu as pltpu

_EPS = 1e-5
_LANE = 128
_MAX_TM = 1024                     # rows per M-tile (multiple of 16)
_VMEM_LIMIT = 32 * 1024 * 1024     # leaves headroom on v7x (64 MiB/TC)


# ----------------------------------------------------------------------------
# small helpers
# ----------------------------------------------------------------------------
def _round_up(x, m):
    return (x + m - 1) // m * m


def _pick_tm(m):
    # >= 2 row tiles (feeds both TensorCores on v7x), multiple of 16 rows
    # (bf16 packs two rows per sublane), capped at _MAX_TM.
    if m <= 16:
        return 16
    return min(_MAX_TM, _round_up((m + 1) // 2, 16))


def _pad_rows(a, tm):
    m = a.shape[0]
    mp = _round_up(m, tm)
    if mp == m:
        return a
    return jnp.pad(a, ((0, mp - m), (0, 0)))


def _pad_axis(a, axis, new):
    if a.shape[axis] == new:
        return a
    pads = [(0, 0)] * a.ndim
    pads[axis] = (0, new - a.shape[axis])
    return jnp.pad(a, pads)


def _cparams():
    return pltpu.CompilerParams(
        dimension_semantics=("parallel",),      # shard grid steps across TCs (v7x)
        vmem_limit_bytes=_VMEM_LIMIT,
    )


def _row_spec(tm, c):
    return pl.BlockSpec((tm, c), lambda i: (i, 0))


def _rep_spec(shape):
    nd = len(shape)
    return pl.BlockSpec(shape, lambda i, _nd=nd: (0,) * _nd)


def _stats_spec(c):
    return pl.BlockSpec((1, 2, c), lambda i: (i, 0, 0))


def _row_mask(tm, m_true):
    rows = pl.program_id(0) * tm + lax.broadcasted_iota(jnp.int32, (tm, 1), 0)
    return (rows < m_true).astype(jnp.float32)


def _partial_stats(y, valid):
    # per-tile column sum and sum-of-squares from the f32 accumulator
    yv = y * valid
    s1 = jnp.sum(yv, axis=0, keepdims=True)       # (1, C)
    s2 = jnp.sum(yv * y, axis=0, keepdims=True)   # (1, C)
    return jnp.concatenate([s1, s2], axis=0)[None]   # (1, 2, C)


def _mean_var(stats, m_true):
    s = jnp.sum(stats, axis=0)                    # (2, C)
    mean = (s[0] / m_true).reshape(1, -1)
    var = (s[1] / m_true).reshape(1, -1) - mean * mean
    return mean, jnp.maximum(var, 0.0)


# ----------------------------------------------------------------------------
# Pallas kernels
# ----------------------------------------------------------------------------
def _mm_stats_kernel(x_ref, w_ref, y_ref, st_ref, *, m_true, tm):
    """1x1 conv as matmul (bf16 operands, f32 accum) + BN partial sums."""
    y = jnp.dot(x_ref[...], w_ref[...], preferred_element_type=jnp.float32)
    y_ref[...] = y.astype(y_ref.dtype)                       # bf16 store
    st_ref[...] = _partial_stats(y, _row_mask(tm, m_true))


def _bn1_conv2_stats_kernel(y1_ref, mk_ref, m1_ref, v1_ref, g1_ref, b1_ref,
                            w2_ref, y2_ref, st_ref, *, s, OH, OW, eps):
    """Fused BN1 + ReLU + 3x3 conv (stride s, pad 1) + BN2 partial sums.

    One batch image per grid step.  y1 arrives spatially padded and split
    into s column phases (JAX-side, 1x copy), so each of the 9 taps is a
    contiguous window + one MXU matmul; the H stride uses a major-dim
    reshape.  The f32 accumulation never leaves registers/VMEM.
    """
    C = y1_ref.shape[-1]
    Wpc = y1_ref.shape[2]
    scale = lax.rsqrt(v1_ref[...] + eps) * g1_ref[...]        # (1, C)
    shift = b1_ref[...] - m1_ref[...] * scale                 # (1, C)

    phases = []
    for p in range(s):
        a = y1_ref[p].astype(jnp.float32) * scale + shift     # (Hp, Wpc, C)
        phases.append(jnp.maximum(a, 0.0) * mk_ref[p])        # zero pad positions

    sub_aligned = (OW % 8 == 0)
    if sub_aligned:
        acc = jnp.zeros((OH * OW, C), jnp.float32)
    else:
        accs = [jnp.zeros((OW, C), jnp.float32) for _ in range(OH)]

    for kh in range(3):
        for kw in range(3):
            ph = phases[kw % s]
            c0 = kw // s
            rows = ph[kh:kh + s * OH]                          # (s*OH, Wpc, C)
            if s > 1:
                rows = rows.reshape(OH, s, Wpc, C)[:, 0]       # (OH, Wpc, C)
            win = rows[:, c0:c0 + OW, :]                       # (OH, OW, C)
            wt = w2_ref[kh * 3 + kw]                           # (C, C) bf16
            if sub_aligned:
                acc = acc + jnp.dot(
                    win.reshape(OH * OW, C).astype(jnp.bfloat16), wt,
                    preferred_element_type=jnp.float32)
            else:
                for r in range(OH):
                    accs[r] = accs[r] + jnp.dot(
                        win[r].astype(jnp.bfloat16), wt,
                        preferred_element_type=jnp.float32)

    if sub_aligned:
        y2_ref[0] = acc.astype(y2_ref.dtype)
        s1 = jnp.sum(acc, axis=0, keepdims=True)
        s2 = jnp.sum(acc * acc, axis=0, keepdims=True)
    else:
        s1 = jnp.zeros((1, C), jnp.float32)
        s2 = jnp.zeros((1, C), jnp.float32)
        for r in range(OH):
            y2_ref[0, r * OW:(r + 1) * OW, :] = accs[r].astype(y2_ref.dtype)
            s1 = s1 + jnp.sum(accs[r], axis=0, keepdims=True)
            s2 = s2 + jnp.sum(accs[r] * accs[r], axis=0, keepdims=True)
    st_ref[0, 0:1, :] = s1
    st_ref[0, 1:2, :] = s2


def _bn_mm_stats_kernel(y2_ref, m2_ref, v2_ref, g2_ref, b2_ref, w3_ref,
                        y3_ref, st3_ref, *, eps, m_true, tm):
    """BN(conv2) fused with conv3 matmul + conv3 partial stats (identity path)."""
    a2 = (y2_ref[...].astype(jnp.float32) - m2_ref[...]) \
        * lax.rsqrt(v2_ref[...] + eps) * g2_ref[...] + b2_ref[...]
    y3 = jnp.dot(a2.astype(jnp.bfloat16), w3_ref[...],
                 preferred_element_type=jnp.float32)
    y3_ref[...] = y3.astype(y3_ref.dtype)
    st3_ref[...] = _partial_stats(y3, _row_mask(tm, m_true))


def _bn_mm_sc_stats_kernel(y2_ref, m2_ref, v2_ref, g2_ref, b2_ref, w3_ref,
                           xs_ref, w4_ref, y3_ref, sc_ref, st3_ref, st4_ref,
                           *, eps, m_true, tm):
    """BN(conv2) + conv3 matmul + shortcut 1x1 conv + both partial stats."""
    valid = _row_mask(tm, m_true)
    a2 = (y2_ref[...].astype(jnp.float32) - m2_ref[...]) \
        * lax.rsqrt(v2_ref[...] + eps) * g2_ref[...] + b2_ref[...]
    y3 = jnp.dot(a2.astype(jnp.bfloat16), w3_ref[...],
                 preferred_element_type=jnp.float32)
    ysc = jnp.dot(xs_ref[...], w4_ref[...], preferred_element_type=jnp.float32)
    y3_ref[...] = y3.astype(y3_ref.dtype)
    sc_ref[...] = ysc.astype(sc_ref.dtype)
    st3_ref[...] = _partial_stats(y3, valid)
    st4_ref[...] = _partial_stats(ysc, valid)


def _bn_add_relu_kernel(y3_ref, m3_ref, v3_ref, g3_ref, b3_ref, res_ref, o_ref,
                        *, eps):
    """BN(conv3) + identity residual add + ReLU."""
    out = (y3_ref[...].astype(jnp.float32) - m3_ref[...]) \
        * lax.rsqrt(v3_ref[...] + eps) * g3_ref[...] + b3_ref[...]
    o_ref[...] = jnp.maximum(out + res_ref[...].astype(jnp.float32),
                             0.0).astype(o_ref.dtype)


def _bn2_add_relu_kernel(y3_ref, m3_ref, v3_ref, g3_ref, b3_ref,
                         sc_ref, m4_ref, v4_ref, g4_ref, b4_ref, o_ref, *, eps):
    """BN(conv3) + BN(shortcut conv) + residual add + ReLU, fully fused."""
    out = (y3_ref[...].astype(jnp.float32) - m3_ref[...]) \
        * lax.rsqrt(v3_ref[...] + eps) * g3_ref[...] + b3_ref[...]
    res = (sc_ref[...].astype(jnp.float32) - m4_ref[...]) \
        * lax.rsqrt(v4_ref[...] + eps) * g4_ref[...] + b4_ref[...]
    o_ref[...] = jnp.maximum(out + res, 0.0).astype(o_ref.dtype)


# ----------------------------------------------------------------------------
# pallas_call wrappers (M-tiled / batch-tiled grids, pipelined, megacore-parallel)
# ----------------------------------------------------------------------------
def conv_matmul_stats(x2, w, m_true, tm):
    mp, kdim = x2.shape
    cout = w.shape[1]
    nt = mp // tm
    return pl.pallas_call(
        functools.partial(_mm_stats_kernel, m_true=m_true, tm=tm),
        grid=(nt,),
        in_specs=[_row_spec(tm, kdim), _rep_spec((kdim, cout))],
        out_specs=[_row_spec(tm, cout), _stats_spec(cout)],
        out_shape=[jax.ShapeDtypeStruct((mp, cout), jnp.bfloat16),
                   jax.ShapeDtypeStruct((nt, 2, cout), jnp.float32)],
        compiler_params=_cparams(),
        cost_estimate=pl.CostEstimate(
            flops=2 * mp * kdim * cout, transcendentals=0,
            bytes_accessed=mp * kdim * 2 + kdim * cout * 2
            + mp * cout * 2 + nt * 2 * cout * 4),
    )(x2, w)


def bn1_conv2_stats(y1ph, mk, mean1, var1, g1, b1, w2r, *, n, s, hp, wpc, oh, ow):
    c = y1ph.shape[-1]
    return pl.pallas_call(
        functools.partial(_bn1_conv2_stats_kernel, s=s, OH=oh, OW=ow, eps=_EPS),
        grid=(n,),
        in_specs=[
            pl.BlockSpec((s, hp, wpc, c), lambda i: (i, 0, 0, 0)),
            _rep_spec((s, hp, wpc, c)),
            _rep_spec((1, c)), _rep_spec((1, c)),
            _rep_spec((1, c)), _rep_spec((1, c)),
            _rep_spec((9, c, c)),
        ],
        out_specs=[pl.BlockSpec((1, oh * ow, c), lambda i: (i, 0, 0)),
                   _stats_spec(c)],
        out_shape=[jax.ShapeDtypeStruct((n, oh * ow, c), jnp.bfloat16),
                   jax.ShapeDtypeStruct((n, 2, c), jnp.float32)],
        compiler_params=_cparams(),
        cost_estimate=pl.CostEstimate(
            flops=2 * n * oh * ow * 9 * c * c, transcendentals=0,
            bytes_accessed=y1ph.size * 2 + mk.size * 4 + 9 * c * c * 2
            + n * oh * ow * c * 2 + n * 2 * c * 4),
    )(y1ph, mk, mean1, var1, g1, b1, w2r)


def bn_mm_stats(y2, mean2, var2, g2, b2, w3, m_true, tm):
    mp, c2 = y2.shape
    c3 = w3.shape[1]
    nt = mp // tm
    return pl.pallas_call(
        functools.partial(_bn_mm_stats_kernel, eps=_EPS, m_true=m_true, tm=tm),
        grid=(nt,),
        in_specs=[_row_spec(tm, c2)] + [_rep_spec((1, c2))] * 4
        + [_rep_spec((c2, c3))],
        out_specs=[_row_spec(tm, c3), _stats_spec(c3)],
        out_shape=[jax.ShapeDtypeStruct((mp, c3), jnp.bfloat16),
                   jax.ShapeDtypeStruct((nt, 2, c3), jnp.float32)],
        compiler_params=_cparams(),
        cost_estimate=pl.CostEstimate(
            flops=2 * mp * c2 * c3, transcendentals=0,
            bytes_accessed=mp * c2 * 2 + c2 * c3 * 2
            + mp * c3 * 2 + nt * 2 * c3 * 4),
    )(y2, mean2, var2, g2, b2, w3)


def bn_mm_sc_stats(y2, mean2, var2, g2, b2, w3, xs, w4, m_true, tm):
    mp, c2 = y2.shape
    c3 = w3.shape[1]
    cin = xs.shape[1]
    nt = mp // tm
    return pl.pallas_call(
        functools.partial(_bn_mm_sc_stats_kernel, eps=_EPS, m_true=m_true, tm=tm),
        grid=(nt,),
        in_specs=[_row_spec(tm, c2)] + [_rep_spec((1, c2))] * 4
        + [_rep_spec((c2, c3)), _row_spec(tm, cin), _rep_spec((cin, c3))],
        out_specs=[_row_spec(tm, c3), _row_spec(tm, c3),
                   _stats_spec(c3), _stats_spec(c3)],
        out_shape=[jax.ShapeDtypeStruct((mp, c3), jnp.bfloat16),
                   jax.ShapeDtypeStruct((mp, c3), jnp.bfloat16),
                   jax.ShapeDtypeStruct((nt, 2, c3), jnp.float32),
                   jax.ShapeDtypeStruct((nt, 2, c3), jnp.float32)],
        compiler_params=_cparams(),
        cost_estimate=pl.CostEstimate(
            flops=2 * mp * (c2 + cin) * c3, transcendentals=0,
            bytes_accessed=mp * c2 * 2 + mp * cin * 2 + (c2 + cin) * c3 * 2
            + 2 * mp * c3 * 2 + 2 * nt * 2 * c3 * 4),
    )(y2, mean2, var2, g2, b2, w3, xs, w4)


def bn_add_relu(y3, mean3, var3, g3, b3, res, tm):
    mp, c3 = y3.shape
    nt = mp // tm
    return pl.pallas_call(
        functools.partial(_bn_add_relu_kernel, eps=_EPS),
        grid=(nt,),
        in_specs=[_row_spec(tm, c3)] + [_rep_spec((1, c3))] * 4
        + [_row_spec(tm, c3)],
        out_specs=_row_spec(tm, c3),
        out_shape=jax.ShapeDtypeStruct((mp, c3), jnp.float32),
        compiler_params=_cparams(),
        cost_estimate=pl.CostEstimate(
            flops=7 * mp * c3, transcendentals=0,
            bytes_accessed=2 * mp * c3 * 2 + mp * c3 * 4),
    )(y3, mean3, var3, g3, b3, res)


def bn2_add_relu(y3, mean3, var3, g3, b3, sc, mean4, var4, g4, b4, tm):
    mp, c3 = y3.shape
    nt = mp // tm
    return pl.pallas_call(
        functools.partial(_bn2_add_relu_kernel, eps=_EPS),
        grid=(nt,),
        in_specs=[_row_spec(tm, c3)] + [_rep_spec((1, c3))] * 4
        + [_row_spec(tm, c3)] + [_rep_spec((1, c3))] * 4,
        out_specs=_row_spec(tm, c3),
        out_shape=jax.ShapeDtypeStruct((mp, c3), jnp.float32),
        compiler_params=_cparams(),
        cost_estimate=pl.CostEstimate(
            flops=12 * mp * c3, transcendentals=0,
            bytes_accessed=2 * mp * c3 * 2 + mp * c3 * 4),
    )(y3, mean3, var3, g3, b3, sc, mean4, var4, g4, b4)


# ----------------------------------------------------------------------------
# Bottleneck module (deterministic synthetic parameters)
# ----------------------------------------------------------------------------
class BottleneckPallas:
    def __init__(self, key, in_channel, out_channel, strides=1, same_shape=True,
                 bottle=True):
        self.same_shape = same_shape
        self.bottle = bottle
        if not same_shape:
            strides = 2
        self.strides = strides
        c1, c4 = out_channel, out_channel * 4
        self.cin, self.c1, self.c4 = in_channel, c1, c4
        self.cinp = _round_up(in_channel, _LANE)
        self.c1p = _round_up(c1, _LANE)
        self.c4p = _round_up(c4, _LANE)
        k = jax.random.split(key, 12)

        def conv_w(kk, fan_in, shape):
            bound = (1.0 / fan_in) ** 0.5
            return jax.random.uniform(kk, shape, jnp.float32, -bound, bound)

        # --- unpadded parameters (used by the pure-JAX reference) ---
        self.w1 = conv_w(k[0], in_channel, (in_channel, c1))
        self.w2_hwio = conv_w(k[1], 9 * c1, (3, 3, c1, c1))
        self.w3 = conv_w(k[2], c1, (c1, c4))
        self.g1 = 1.0 + 0.1 * jax.random.normal(k[3], (1, c1), jnp.float32)
        self.b1 = 0.1 * jax.random.normal(k[4], (1, c1), jnp.float32)
        self.g2 = 1.0 + 0.1 * jax.random.normal(k[5], (1, c1), jnp.float32)
        self.b2 = 0.1 * jax.random.normal(k[6], (1, c1), jnp.float32)
        self.g3 = 1.0 + 0.1 * jax.random.normal(k[7], (1, c4), jnp.float32)
        self.b3 = 0.1 * jax.random.normal(k[8], (1, c4), jnp.float32)
        self.use_shortcut = (not same_shape) or (not bottle)
        if self.use_shortcut:
            self.w4 = conv_w(k[9], in_channel, (in_channel, c4))
            self.g4 = 1.0 + 0.1 * jax.random.normal(k[10], (1, c4), jnp.float32)
            self.b4 = 0.1 * jax.random.normal(k[11], (1, c4), jnp.float32)

        # --- 128-lane padded kernel parameters (weights bf16, BN f32) ---
        def padw(w, r, c):
            return jnp.pad(w, ((0, r - w.shape[0]),
                               (0, c - w.shape[1]))).astype(jnp.bfloat16)

        def padg(g, c):   # pad gamma with 1 so padded channels stay exactly 0
            return jnp.pad(g, ((0, 0), (0, c - g.shape[1])), constant_values=1.0)

        def padb(b, c):
            return jnp.pad(b, ((0, 0), (0, c - b.shape[1])))

        cinp, c1p, c4p = self.cinp, self.c1p, self.c4p
        self.w1p = padw(self.w1, cinp, c1p)
        w2p = jnp.pad(self.w2_hwio,
                      ((0, 0), (0, 0), (0, c1p - c1), (0, c1p - c1)))
        self.w2p = w2p.reshape(9, c1p, c1p).astype(jnp.bfloat16)
        self.w3p = padw(self.w3, c1p, c4p)
        self.g1p, self.b1p = padg(self.g1, c1p), padb(self.b1, c1p)
        self.g2p, self.b2p = padg(self.g2, c1p), padb(self.b2, c1p)
        self.g3p, self.b3p = padg(self.g3, c4p), padb(self.b3, c4p)
        if self.use_shortcut:
            self.w4p = padw(self.w4, cinp, c4p)
            self.g4p, self.b4p = padg(self.g4, c4p), padb(self.b4, c4p)

    def __call__(self, x_nchw):
        x = jnp.transpose(x_nchw, (0, 2, 3, 1)).astype(jnp.float32)  # NCHW->NHWC
        N, H, W, Cin = x.shape
        s = self.strides
        cinp, c1p, c4p = self.cinp, self.c1p, self.c4p
        xp = _pad_axis(x, 3, cinp)                      # lane-pad input channels

        # ---- A) conv1 (1x1) + BN1 partial stats -----------------------------
        M0 = N * H * W
        tm0 = _pick_tm(M0)
        x0 = _pad_rows(xp.reshape(M0, cinp).astype(jnp.bfloat16), tm0)
        y1, st1 = conv_matmul_stats(x0, self.w1p, M0, tm0)       # y1 bf16
        mean1, var1 = _mean_var(st1, M0)

        # ---- B) fused BN1+ReLU + 3x3 conv2 + BN2 partial stats --------------
        OH = (H - 1) // s + 1
        OW = (W - 1) // s + 1
        Hp = max(H + 2, s * OH + 2)
        Wp = _round_up(max(W + 2, s * (2 // s + OW)), s)
        Wpc = Wp // s
        y1img = y1[:M0].reshape(N, H, W, c1p)
        # spatial pad + split W into s column phases (pure layout, ~1x copy)
        y1pad = jnp.pad(y1img, ((0, 0), (1, Hp - H - 1), (1, Wp - W - 1), (0, 0)))
        y1ph = y1pad.reshape(N, Hp, Wpc, s, c1p).transpose(0, 3, 1, 2, 4)
        y1ph = y1ph.reshape(N * s, Hp, Wpc, c1p)
        ones = jnp.ones((1, H, W, 1), jnp.float32)
        mk = jnp.pad(ones, ((0, 0), (1, Hp - H - 1), (1, Wp - W - 1), (0, 0)))
        mk = mk.reshape(1, Hp, Wpc, s, 1).transpose(0, 3, 1, 2, 4)
        mk = jnp.broadcast_to(mk.reshape(s, Hp, Wpc, 1), (s, Hp, Wpc, c1p))
        y2, st2 = bn1_conv2_stats(y1ph, mk, mean1, var1, self.g1p, self.b1p,
                                  self.w2p, n=N, s=s, hp=Hp, wpc=Wpc,
                                  oh=OH, ow=OW)                  # y2 bf16
        M1 = N * OH * OW
        mean2, var2 = _mean_var(st2, M1)

        # ---- C) BN2 + conv3 (1x1) [+ fused shortcut 1x1 conv] ----------------
        tm1 = _pick_tm(M1)
        y2r = _pad_rows(y2.reshape(M1, c1p), tm1)
        if self.use_shortcut:
            xs = xp[:, ::s, ::s, :].reshape(M1, cinp)
            xs = _pad_rows(xs.astype(jnp.bfloat16), tm1)
            y3, ysc, st3, st4 = bn_mm_sc_stats(
                y2r, mean2, var2, self.g2p, self.b2p, self.w3p, xs, self.w4p,
                M1, tm1)
            mean3, var3 = _mean_var(st3, M1)
            mean4, var4 = _mean_var(st4, M1)
            out = bn2_add_relu(y3, mean3, var3, self.g3p, self.b3p,
                               ysc, mean4, var4, self.g4p, self.b4p, tm1)
        else:
            # identity shortcut: requires in_channel == 4*out_channel, stride 1
            y3, st3 = bn_mm_stats(y2r, mean2, var2, self.g2p, self.b2p,
                                  self.w3p, M1, tm1)
            mean3, var3 = _mean_var(st3, M1)
            res = _pad_rows(xp.reshape(M0, cinp).astype(jnp.bfloat16), tm1)
            out = bn_add_relu(y3, mean3, var3, self.g3p, self.b3p, res, tm1)

        out = out[:M1, :self.c4].reshape(N, OH, OW, self.c4)
        return jnp.transpose(out, (0, 3, 1, 2))        # NHWC -> NCHW


# ----------------------------------------------------------------------------
# Pure-JAX reference (f32 HIGHEST; correctness check only)
# ----------------------------------------------------------------------------
def _ref_conv(x, w_hwio, stride, pad):
    return lax.conv_general_dilated(
        x, w_hwio, (stride, stride), [(pad, pad), (pad, pad)],
        dimension_numbers=("NHWC", "HWIO", "NHWC"),
        precision=lax.Precision.HIGHEST)


def _ref_bn(y, gamma, beta):
    mean = jnp.mean(y, axis=(0, 1, 2), keepdims=True)
    var = jnp.mean(jnp.square(y - mean), axis=(0, 1, 2), keepdims=True)
    return (y - mean) * lax.rsqrt(var + _EPS) \
        * gamma.reshape(1, 1, 1, -1) + beta.reshape(1, 1, 1, -1)


def _ref_forward(m: BottleneckPallas, x_nchw):
    x = jnp.transpose(x_nchw, (0, 2, 3, 1)).astype(jnp.float32)
    s = m.strides
    out = _ref_bn(_ref_conv(x, m.w1[None, None], 1, 0), m.g1, m.b1)
    out = jnp.maximum(out, 0.0)
    out = _ref_bn(_ref_conv(out, m.w2_hwio, s, 1), m.g2, m.b2)
    out = _ref_bn(_ref_conv(out, m.w3[None, None], 1, 0), m.g3, m.b3)
    if m.use_shortcut:
        sc = _ref_bn(_ref_conv(x, m.w4[None, None], s, 0), m.g4, m.b4)
    else:
        sc = x
    out = jnp.maximum(out + sc, 0.0)
    return jnp.transpose(out, (0, 3, 1, 2))


# ----------------------------------------------------------------------------
if __name__ == "__main__":
    key = jax.random.PRNGKey(0)
    kx, kp1, kp2, kp3 = jax.random.split(key, 4)

    # NCHW: N=2, C=16, H=W=8 (identity shortcut needs in_channel == 4*out_channel)
    x = jax.random.normal(kx, (2, 16, 8, 8), jnp.float32)

    configs = [
        BottleneckPallas(kp1, in_channel=16, out_channel=4),                    # default
        BottleneckPallas(kp2, in_channel=16, out_channel=4, bottle=False),      # conv shortcut
        BottleneckPallas(kp3, in_channel=16, out_channel=4, same_shape=False),  # stride-2
    ]

    for mod in configs:
        out = jax.block_until_ready(mod(x))
        ref = jax.block_until_ready(_ref_forward(mod, x))
        assert out.shape == ref.shape, (out.shape, ref.shape)
        # bf16 MXU operands / bf16 intermediates vs the f32 HIGHEST reference
        assert bool(jnp.allclose(out, ref, atol=6e-2, rtol=6e-2)), \
            float(jnp.max(jnp.abs(out - ref)))

    print("KERNEL_OK")
</pallas_src>

<mosaic_0001>
module attributes {stable_mosaic.version = 11 : i64} {
  func.func @_mm_stats_kernel(%arg0: i32, %arg1: memref<64x128xbf16, #tpu.memory_space<vmem>>, %arg2: memref<128x128xbf16, #tpu.memory_space<vmem>>, %arg3: memref<64x128xbf16, #tpu.memory_space<vmem>>, %arg4: memref<1x2x128xf32, #tpu.memory_space<vmem>>) attributes {dimension_semantics = [#tpu.dimension_semantics<parallel>], iteration_bounds = array<i64: 2>, scalar_prefetch = 0 : i64, scratch_operands = 0 : i64, tpu.core_type = #tpu.core_type<tc>, window_params = [{transform_indices = @transform_0, window_bounds = array<i64: 64, 128>}, {pipeline_mode = #tpu.pipeline_mode<synchronous>, transform_indices = @transform_1, window_bounds = array<i64: 128, 128>}, {transform_indices = @transform_2, window_bounds = array<i64: 64, 128>}, {transform_indices = @transform_3, window_bounds = array<i64: 1, 2, 128>}]} {
    %c0 = arith.constant 0 : index
    %c0_0 = arith.constant 0 : index
    %0 = vector.load %arg1[%c0, %c0_0] : memref<64x128xbf16, #tpu.memory_space<vmem>>, vector<64x128xbf16>
    %c0_1 = arith.constant 0 : index
    %c0_2 = arith.constant 0 : index
    %1 = vector.load %arg2[%c0_1, %c0_2] : memref<128x128xbf16, #tpu.memory_space<vmem>>, vector<128x128xbf16>
    %cst = arith.constant dense<0.000000e+00> : vector<64x128xf32>
    %2 = tpu.matmul %0, %1, %cst {dimension_numbers = #tpu.dot_dimension_numbers<[1], [0], [0], [1], [0, 0, 1, 1], [], []>} : vector<64x128xbf16>, vector<128x128xbf16>, vector<64x128xf32> -> vector<64x128xf32>
    %3 = arith.truncf %2 : vector<64x128xf32> to vector<64x128xbf16>
    %c0_3 = arith.constant 0 : index
    %c0_4 = arith.constant 0 : index
    %4 = vector.load %arg3[%c0_3, %c0_4] : memref<64x128xbf16, #tpu.memory_space<vmem>>, vector<64x128xbf16>
    tpu.vector_store %arg3[%c0_3, %c0_4], %3 {strides = array<i32>} : memref<64x128xbf16, #tpu.memory_space<vmem>>, vector<64x128xbf16>,
    %c64_i32 = arith.constant 64 : i32
    %5 = arith.muli %arg0, %c64_i32 : i32
    %6 = tpu.iota {dimensions = array<i32: 0>} : vector<64x1xi32>
    %7 = vector.broadcast %5 : i32 to vector<64x1xi32>
    %8 = arith.addi %7, %6 : vector<64x1xi32>
    %c128_i32 = arith.constant 128 : i32
    %9 = vector.broadcast %c128_i32 : i32 to vector<64x1xi32>
    %10 = arith.cmpi slt, %8, %9 : vector<64x1xi32>
    %11 = arith.extui %10 : vector<64x1xi1> to vector<64x1xi32>
    %12 = arith.sitofp %11 : vector<64x1xi32> to vector<64x1xf32>
    %13 = vector.broadcast %12 : vector<64x1xf32> to vector<64x128xf32>
    %14 = arith.mulf %2, %13 : vector<64x128xf32>
    %cst_5 = arith.constant dense<0.000000e+00> : vector<128xf32>
    %15 = vector.multi_reduction <add>, %14, %cst_5 [0] : vector<64x128xf32> to vector<128xf32>
    %16 = vector.shape_cast %15 : vector<128xf32> to vector<1x128xf32>
    %17 = arith.mulf %14, %2 : vector<64x128xf32>
    %cst_6 = arith.constant dense<0.000000e+00> : vector<128xf32>
    %18 = vector.multi_reduction <add>, %17, %cst_6 [0] : vector<64x128xf32> to vector<128xf32>
    %19 = vector.shape_cast %18 : vector<128xf32> to vector<1x128xf32>
    %20 = tpu.concatenate %16, %19 in 0 : vector<1x128xf32>, vector<1x128xf32> -> vector<2x128xf32>
    %21 = vector.shape_cast %20 : vector<2x128xf32> to vector<1x2x128xf32>
    %c0_7 = arith.constant 0 : index
    %c0_8 = arith.constant 0 : index
    %c0_9 = arith.constant 0 : index
    %22 = vector.load %arg4[%c0_7, %c0_8, %c0_9] : memref<1x2x128xf32, #tpu.memory_space<vmem>>, vector<1x2x128xf32>
    tpu.vector_store %arg4[%c0_7, %c0_8, %c0_9], %21 {strides = array<i32>} : memref<1x2x128xf32, #tpu.memory_space<vmem>>, vector<1x2x128xf32>,
    return
  }
  func.func @transform_0(%arg0: i32) -> (i32, i32) {
    %c0_i32 = arith.constant 0 : i32
    %c0_i32_0 = arith.constant 0 : i32
    return %arg0, %c0_i32 : i32, i32
  }
  func.func @transform_1(%arg0: i32) -> (i32, i32) {
    %c0_i32 = arith.constant 0 : i32
    %c0_i32_0 = arith.constant 0 : i32
    %c0_i32_1 = arith.constant 0 : i32
    return %c0_i32, %c0_i32_0 : i32, i32
  }
  func.func @transform_2(%arg0: i32) -> (i32, i32) {
    %c0_i32 = arith.constant 0 : i32
    %c0_i32_0 = arith.constant 0 : i32
    return %arg0, %c0_i32 : i32, i32
  }
  func.func @transform_3(%arg0: i32) -> (i32, i32, i32) {
    %c0_i32 = arith.constant 0 : i32
    %c0_i32_0 = arith.constant 0 : i32
    %c0_i32_1 = arith.constant 0 : i32
    return %arg0, %c0_i32, %c0_i32_0 : i32, i32, i32
  }
}

</mosaic_0001>

<bundles_post_ra>
// kernel: tpu_custom_call.1
= control target key start
LH: loop header
LB: loop body
LE: loop exit
PB: predicated region body
PF: predicated region fallthrough
CT: control target
= control target key end

     0   :  { %9 = vsyncpa [#allocation3], 0  ;;  %s1348_s0 = inlined_call_operand.hbm [shape: bf16[128,128], index: 0, kind: input, shape index: {}]   ;;  %s1349_s1 = inlined_call_operand.hbm [shape: bf16[128,128], index: 1, kind: input, shape index: {}]   ;;  %s1350_s2 = inlined_call_operand.hbm [shape: bf16[128,128], index: 2, kind: output, shape index: {0}]   ;;  %s1351_s3 = inlined_call_operand.hbm [shape: f32[2,2,128], index: 3, kind: output, shape index: {1}]  }
   0x1   :  { %11 = vsyncpa [#allocation3 + $0x1], 0 }
   0x2   :  { %12 = vsyncpa [#allocation6], 0 }
   0x3   :  { %13 = vsyncpa [#allocation4], 0 }
   0x4   :  { %15 = vsyncpa [#allocation4 + $0x1], 0 }
   0x5   :  { %16 = vsyncpa [#allocation9], 0 }
   0x6   :  { %18 = vsyncpa [#allocation9 + $0x1], 0  ;;  %s1057_s12 = smov 0   ;;  %s1059_s13 = smov 0  }
   0x7   :  { %s1061_s14 = smov 0   ;;  %s1063_s15 = smov 0  }
   0x8 LB: > { %s1078_s16 = sadd.s32 4294967295, %s1026_s15   ;;  %s654_s17 = sadd.s32 4294967294, %s1026_s15   ;;  %s1026_s15 = sphi %s1063_s15, %s1371_s15   ;;  %s1022_s14 = sphi %s1061_s14, %s1370_s14   ;;  %s1018_s13 = sphi %s1059_s13, %s1369_s13   ;;  %s1014_s12 = sphi %s1057_s12, %s1368_s12  }
   0x9   : > { %p44_p0 = scmp.ne.s32.totalorder %s1018_s13, %s1014_s12  ;;  %p1352_p1 = scmp.eq.s32.totalorder %s1078_s16, 0 }
   0xa   : > { %p95_p3 = scmp.eq.s32.totalorder %s654_s17, 1  ;;  %p655_p5 = scmp.ge.s32.totalorder %s1026_s15, 1 }
   0xb   : > { %p1087_p4 = por %p1352_p1, %p44_p0  ;;  %p128_p7 = scmp.lt.s32.totalorder %s1026_s15, 3 }
   0xc   : > { %p1092_p6 = por %p95_p3, %p44_p0  ;;  %s1028_s21 = smov [#allocation5]  }
   0xd   : > { %s1355_s18 = scalar_select %p1087_p4, 1, 0 }
   0xe   : > { %s1356_s19 = scalar_select %p1092_p6, 1, 0 }
   0xf   : > { %p1097_p8 = pnand %p655_p5, %p128_p7  ;;  %s140_s22 = sshll.u32 %s1028_s21, 4  ;;  %s1101_s22 = int_to_ptr.vmem [resolvable:$true] %s140_s22 }
  0x10   : > { %s1113_s24 = sadd.s32 1, %s1026_s15   ;;  %s31_s25 = sadd.s32 1, %s1022_s14 }
  0x11   : > { %s1357_s20 = scalar_select %p1097_p8, 1, 0 }
  0x12   : > { %p797_p9 = pneg %p1097_p8  ;;  %s28_s26 = ssub.s32 %s1026_s15, %s1113_s24 }
  0x13   : > { %s866_s29 = scalar_lea.hbm %s1349_s1, 1024 }
  0x14   : > { %p1108_p11 = pnand %p797_p9, %p1352_p1  ;;  %p867_p12 = scmp.ne.s32.totalorder %s1349_s1, %s866_s29 }
  0x15   : > { %p873_p5 = scmp.lt.u32.totalorder %s866_s29, %s1349_s1 }
  0x16   : > { %p868_p13 = pneg %p1108_p11 }
  0x18   : > { %p869_p0 = pnand %p868_p13, %p867_p12 }
  0x1a   : > { %p870_p3 = pneg %p869_p0 }
  0x1c   : > { %p875_p7 = pnand %p873_p5, %p870_p3 }
  0x1e   : > { %878 = shalt.err (!%p875_p7)
}
  0x1f   : > { %s879_s7 = scalar_lea.vmem %s1101_s22, 1024  ;;  %p887_p2 = scmp.lt.s32.totalorder %s1101_s22, %s1101_s22 }
  0x20   : > { %p880_p9 = scmp.ne.s32.totalorder %s1101_s22, %s879_s7  ;;  %p888_p6 = scmp.lt.s32.totalorder %s879_s7, %s879_s7 }
  0x22   : > { %p882_p10 = pnand %p880_p9, %p868_p13  ;;  %p889_p4 = por %p888_p6, %p887_p2 }
  0x24   : > { %p883_p1 = pneg %p882_p10 }
  0x26   : > { %p890_p8 = pnand %p889_p4, %p883_p1 }
  0x28   : > { %893 = shalt.err (!%p890_p8)
}
  0x29   : > { %s1029_s8 = smov 64   ;;  %s1030_s9 = smov 4  }
  0x2a   : > { %800 = dma.hbm_to_vmem [thread:$0]  (!%p1108_p11), %s1349_s1, 1024, %s1101_s22, [#allocation6], %s1029_s8, %s1029_s8, %s1030_s9  }
  0x2b   : > { %p29_p1 = scmp.eq.s32.totalorder %s28_s26, 0  ;;  %p38_p2 = scmp.ne.s32.totalorder %s1022_s14, %s1018_s13 }
  0x2c   : > { %p39_p4 = scmp.eq.s32.totalorder %s1026_s15, 0  ;;  %p813_p6 = scmp.lt.s32.totalorder %s1026_s15, 2 }
  0x2d   : > { %s1147_s17 = scalar_select %p29_p1, %s1022_s14, %s31_s25  }
  0x2e   : > { %p40_p8 = por %p39_p4, %p38_p2  ;;  %p1359_p10 = scmp.eq.s32.totalorder %s1078_s16, 1 }
  0x2f   : > { %s154_s23 = sand.u32 1, %s1022_s14   ;;  %s702_s27 = sshll.u32 %s1026_s15, 9 }
  0x30   : > { %p1151_p12 = por %p1359_p10, %p38_p2  ;;  %s658_s28 = sshll.u32 %s154_s23, 5 }
  0x31   : > { %s1160_s4 = scalar_lea.hbm %s1348_s0, %s702_s27  ;;  %s158_s22 = scalar_lea.vmem [#allocation2], %s658_s28 }
  0x32   : > { %s165_s25 = sshll.u32 %s158_s22, 4  ;;  %p1162_p11 = pnand %p813_p6, %p40_p8  ;;  %s1166_s25 = int_to_ptr.vmem [resolvable:$true] %s165_s25 }
  0x33   : > { %s1168_s5 = scalar_lea.sflag [#allocation3], %s154_s23  ;;  %s894_s6 = scalar_lea.hbm %s1160_s4, 512 }
  0x34   : > { %p895_p13 = scmp.ne.s32.totalorder %s1160_s4, %s894_s6  ;;  %p896_p0 = pneg %p1162_p11 }
  0x35   : > { %s899_s11 = scalar_lea.hbm %s1348_s0, 1024  ;;  %p900_p7 = scmp.lt.u32.totalorder %s1160_s4, %s1348_s0 }
  0x36   : > { %p897_p3 = pnand %p896_p0, %p895_p13  ;;  %p901_p9 = scmp.lt.u32.totalorder %s899_s11, %s894_s6 }
  0x37   : > { %p903_p2 = scmp.lt.u32.totalorder %s894_s6, %s1160_s4 }
  0x38   : > { %p898_p5 = pneg %p897_p3  ;;  %p902_p1 = por %p901_p9, %p900_p7 }
  0x3a   : > { %p904_p4 = por %p903_p2, %p902_p1 }
  0x3c   : > { %p905_p6 = pnand %p904_p4, %p898_p5 }
  0x3e   : > { %908 = shalt.err (!%p905_p6)
}
  0x3f   : > { %s909_s23 = scalar_lea.vmem %s1166_s25, 512  ;;  %s1031_s29 = smov [#allocation2]  }
  0x40   : > { %p910_p8 = scmp.ne.s32.totalorder %s1166_s25, %s909_s23  ;;  %s914_s30 = sshll.u32 %s1031_s29, 4  ;;  %s915_s30 = int_to_ptr.vmem [resolvable:$false] %s914_s30 }
  0x41   : > { %s916_s22 = scalar_lea.vmem %s915_s30, 1024  ;;  %p917_p3 = scmp.lt.s32.totalorder %s1166_s25, %s915_s30 }
  0x42   : > { %p912_p10 = pnand %p910_p8, %p896_p0  ;;  %p918_p7 = scmp.lt.s32.totalorder %s916_s22, %s909_s23 }
  0x44   : > { %p913_p13 = pneg %p912_p10  ;;  %p919_p9 = por %p918_p7, %p917_p3 }
  0x46   : > { %p920_p1 = pnand %p919_p9, %p913_p13 }
  0x48   : > { %923 = shalt.err (!%p920_p1)
}
  0x49   : > { %804 = dma.hbm_to_vmem [thread:$0]  (!%p1162_p11), %s1160_s4, 512, %s1166_s25, %s1168_s5, %s1029_s8, %s1029_s8, %s1030_s9  }
  0x4a   : > { %p1362_p0 = scmp.ne.s32.totalorder %s1357_s20, 0 }
  0x4b   : > { %s1202_s6 = sand.u32 (!%p1362_p0), 1, %s1018_s13   ;;  %p1363_p5 = scmp.ne.s32.totalorder (!%p1362_p0), %s1355_s18, 0 }
  0x4c   : > { %177 = sbr.rel (%p1362_p0) target bundleno = 391 (0x187), region = 28  ;;  %s662_s7 = sshll.u32 (!%p1362_p0), %s1202_s6, 5 }
  0x4d   : > { %s180_s10 = scalar_lea.sflag (!%p1362_p0), [#allocation3], %s1202_s6  ;;  %s1208_s26 = scalar_lea.vmem (!%p1362_p0), [#allocation2], %s662_s7 }
  0x53   : > { %997 = dma.done.wait (%p1363_p5), %s180_s10, 512  }
  0x54   : > { %999 = vsyncadd (%p1363_p5), %s180_s10, 4294966784  ;;  %p1364_p11 = scmp.eq.s32.totalorder %s1078_s16, 0 }
  0x56   : > { %1001 = dma.done.wait (%p1364_p11), [#allocation6], 1024   ;;  %p1365_p2 = pmov %p1364_p11 }
  0x57   : > { %v854_v0 = vld [vmem:[#allocation5] sm:$0xff]   ;;  %v855_v1 = vld [vmem:[#allocation5 + $0x8] sm:$0xff]   ;;  %v856_v2 = vld [vmem:[#allocation5 + $0x10] sm:$0xff]   ;;  %v420_v12 = vlaneseq  ;;  %s686_s18 = sshll.u32 %s1078_s16, 6  ;;  %v1032_v26 = vmov 0.0   ;;  %s1226_s20 = scalar_lea.vmem [#allocation7], %s662_s7 }
  0x58   : > { %1003 = vsyncadd (%p1365_p2), [#allocation6], 4294966272  ;;  %747 = vmatprep.subr.bf16.mxu0 %v854_v0  ;;  %771 = vmatprep.subr.bf16.mxu1 %v854_v0  ;;  %v857_v3 = vld [vmem:[#allocation5 + $0x18] sm:$0xff]   ;;  %v862_v4 = vld [vmem:[%s1208_s26] sm:$0xff]   ;;  %v429_v14 = vstv %s686_s18  ;;  %s526_s8 = sshll.u32 %s1226_s20, 4  ;;  %s711_s9 = sshll.u32 %s1078_s16, 9  ;;  %s1242_s8 = int_to_ptr.vmem [resolvable:$true] %s526_s8 }
  0x59   : > { %748 = vmatpush3.bf16.msra.mxu0 %v854_v0  ;;  %779 = vmatpush3.bf16.msra.mxu1 %v854_v0  ;;  %v864_v5 = vld [vmem:[%s1208_s26 + $0x10] sm:$0xff]   ;;  %v858_v6 = vld [vmem:[#allocation5 + $0x20] sm:$0xff]   ;;  %v859_v7 = vld [vmem:[#allocation5 + $0x28] sm:$0xff]   ;;  %v421_v13 = vshrl.u32 %v420_v12, 7  ;;  %s1249_s5 = scalar_lea.hbm %s1350_s2, %s711_s9  ;;  %s508_s11 = scalar_lea.sflag [#allocation4], %s1202_s6 }
  0x5a   : > { %749 = vmatprep.subr.bf16.mxu0 %v855_v1  ;;  %772 = vmatprep.subr.bf16.mxu1 %v855_v1  ;;  %v860_v8 = vld [vmem:[#allocation5 + $0x30] sm:$0xff]   ;;  %v861_v9 = vld [vmem:[#allocation5 + $0x38] sm:$0xff]   ;;  %v863_v10 = vld [vmem:[%s1208_s26 + $0x8] sm:$0xff]   ;;  %s924_s27 = scalar_lea.vmem %s1242_s8, 512  ;;  %s1033_s28 = smov [#allocation7]  }
  0x5b   : > { %763 = vmatprep.mubr.bf16.mxu0 %v862_v4  ;;  %767 = vmatprep.mubr.bf16.mxu1 %v864_v5  ;;  %v865_v11 = vld [vmem:[%s1208_s26 + $0x18] sm:$0xff]   ;;  %v423_v15 = vadd.s32 16, %v421_v13  ;;  %v422_v16 = vadd.s32 8, %v421_v13  ;;  %v430_v17 = vadd.s32 %v429_v14, %v421_v13  ;;  %v424_v18 = vadd.s32 24, %v421_v13  ;;  %p925_p4 = scmp.ne.s32.totalorder %s1242_s8, %s924_s27  ;;  %s928_s23 = sshll.u32 %s1033_s28, 4  ;;  %s929_s23 = int_to_ptr.vmem [resolvable:$false] %s928_s23 }
  0x5c   : > { %v425_v21 = vadd.s32 32, %v421_v13  ;;  %v426_v23 = vadd.s32 40, %v421_v13  ;;  %v427_v24 = vadd.s32 48, %v421_v13  ;;  %v428_v28 = vadd.s32 56, %v421_v13  ;;  %s930_s29 = scalar_lea.vmem %s929_s23, 1024  ;;  %p931_p10 = scmp.lt.s32.totalorder %s1242_s8, %s929_s23 }
  0x5d   : > { %750 = vmatpush3.bf16.msra.mxu0 %v855_v1  ;;  %780 = vmatpush3.bf16.msra.mxu1 %v855_v1  ;;  %v432_v19 = vadd.s32 %v429_v14, %v423_v15  ;;  %v431_v20 = vadd.s32 %v429_v14, %v422_v16  ;;  %vm438_vm0 = vcmp.lt.s32.totalorder %v430_v17, 128  ;;  %v433_v22 = vadd.s32 %v429_v14, %v424_v18  ;;  %p926_p6 = pnand %p925_p4, %p1151_p12  ;;  %p932_p13 = scmp.lt.s32.totalorder %s930_s29, %s924_s27 }
  0x5e   : > { %751 = vmatprep.subr.bf16.mxu0 %v856_v2  ;;  %773 = vmatprep.subr.bf16.mxu1 %v856_v2  ;;  %v434_v25 = vadd.s32 %v429_v14, %v425_v21  ;;  %v687_v27 = vsel %vm438_vm0, 1.0, %v1032_v26  ;;  %v435_v31 = vadd.s32 %v429_v14, %v426_v23  ;;  %v1233_v35 = vadd.s32 %v429_v14, %v427_v24 }
  0x5f   : > { %vm440_vm1 = vcmp.lt.s32.totalorder %v432_v19, 128  ;;  %vm439_vm2 = vcmp.lt.s32.totalorder %v431_v20, 128  ;;  %vm441_vm3 = vcmp.lt.s32.totalorder %v433_v22, 128  ;;  %v437_v43 = vadd.s32 %v429_v14, %v428_v28  ;;  %p927_p8 = pneg %p926_p6  ;;  %p933_p3 = por %p932_p13, %p931_p10 }
  0x60   : > { %v689_v32 = vsel %vm440_vm1, 1.0, %v1032_v26  ;;  %v688_v34 = vsel %vm439_vm2, 1.0, %v1032_v26  ;;  %vm442_vm4 = vcmp.lt.s32.totalorder %v434_v25, 128  ;;  %v690_v41 = vsel %vm441_vm3, 1.0, %v1032_v26 }
  0x61   : > { %752 = vmatpush3.bf16.msra.mxu0 %v856_v2  ;;  %781 = vmatpush3.bf16.msra.mxu1 %v856_v2  ;;  %vm443_vm5 = vcmp.lt.s32.totalorder %v435_v31, 128  ;;  %vm444_vm6 = vcmp.lt.s32.totalorder %v1233_v35, 128  ;;  %v691_v48 = vsel %vm442_vm4, 1.0, %v1032_v26  ;;  %vm445_vm7 = vcmp.lt.s32.totalorder %v437_v43, 128  ;;  %p934_p7 = pnand %p933_p3, %p927_p8 }
  0x62   : > { %753 = vmatprep.subr.bf16.mxu0 %v857_v3  ;;  %774 = vmatprep.subr.bf16.mxu1 %v857_v3  ;;  %v692_v55 = vsel %vm443_vm5, 1.0, %v1032_v26 }
  0x65   : > { %754 = vmatpush3.bf16.msra.mxu0 %v857_v3  ;;  %782 = vmatpush3.bf16.msra.mxu1 %v857_v3 }
  0x66   : > { %755 = vmatprep.subr.bf16.mxu0 %v858_v6  ;;  %775 = vmatprep.subr.bf16.mxu1 %v858_v6 }
  0x69   : > { %756 = vmatpush3.bf16.msra.mxu0 %v858_v6  ;;  %783 = vmatpush3.bf16.msra.mxu1 %v858_v6 }
  0x6a   : > { %757 = vmatprep.subr.bf16.mxu0 %v859_v7  ;;  %776 = vmatprep.subr.bf16.mxu1 %v859_v7 }
  0x6d   : > { %758 = vmatpush3.bf16.msra.mxu0 %v859_v7  ;;  %784 = vmatpush3.bf16.msra.mxu1 %v859_v7 }
  0x6e   : > { %759 = vmatprep.subr.bf16.mxu0 %v860_v8  ;;  %777 = vmatprep.subr.bf16.mxu1 %v860_v8 }
  0x71   : > { %760 = vmatpush3.bf16.msra.mxu0 %v860_v8  ;;  %785 = vmatpush3.bf16.msra.mxu1 %v860_v8 }
  0x72   : > { %761 = vmatprep.subr.bf16.mxu0 %v861_v9  ;;  %778 = vmatprep.subr.bf16.mxu1 %v861_v9 }
  0x75   : > { %762 = vmatpush3.bf16.msra.mxu0 %v861_v9  ;;  %786 = vmatpush3.bf16.msra.mxu1 %v861_v9 }
  0x78   : > { %764 = vmatmul.mubr.bf16.vlgmr.msra.gmra.mrb[0].mxu0 %v863_v10  ;;  %768 = vmatmul.mubr.bf16.vlgmr.msra.gmra.mrb[0].mxu1 %v865_v11 }
 0x14b   : > { %v765_v29 = vpop.f32.mrb[0].mxu0  ;;  %v1229_v30 = vpop.f32.mrb[0].mxu1 }
 0x14c   : > { %v348_v33 = vpop.f32.mrb[1].mxu0  ;;  %v1235_v36 = vpop.f32.mrb[1].mxu1  ;;  %v464_v45 = vmul.f32 %v765_v29, %v689_v32 }
 0x14d   : > { %v462_v37 = vmul.f32 %v687_v27, %v348_v33  ;;  %v766_v38 = vpop.f32.mrb[2].mxu0  ;;  %v1238_v39 = vpop.f32.mrb[2].mxu1  ;;  %v466_v59 = vmul.f32 %v691_v48, %v1235_v36 }
 0x14e   : > { %v720_v40 = vpack.c.bf16 %v766_v38, %v765_v29  ;;  %v351_v42 = vpop.f32.mrb[3].mxu0  ;;  %v1244_v44 = vpop.f32.mrb[3].mxu1  ;;  %v730_v49 = vpack.c.bf16 %v1238_v39, %v1229_v30  ;;  %v465_v52 = vmul.f32 %v766_v38, %v690_v41  ;;  %v485_v56 = vmul.f32 %v765_v29, %v464_v45 }
 0x14f   : > { %v715_v46 = vpack.c.bf16 %v351_v42, %v348_v33  ;;  %v463_v47 = vmul.f32 %v688_v34, %v351_v42  ;;  %v725_v50 = vpack.c.bf16 %v1244_v44, %v1235_v36  ;;  %v483_v51 = vmul.f32 %v462_v37, %v348_v33 }
 0x150   : > { %732 = vst [vmem:[%s1226_s20 + $0x8] sm:$0xff] %v720_v40   ;;  %734 = vst [vmem:[%s1226_s20 + $0x18] sm:$0xff] %v730_v49  }
 0x151   : > { %716 = vst [vmem:[%s1226_s20] sm:$0xff] %v715_v46   ;;  %v470_v53 = vadd.f32 %v463_v47, %v462_v37  ;;  %v484_v54 = vmul.f32 %v463_v47, %v351_v42  ;;  %733 = vst [vmem:[%s1226_s20 + $0x10] sm:$0xff] %v725_v50  }
 0x153   : > { %v471_v57 = vadd.f32 %v470_v53, %v464_v45  ;;  %v491_v58 = vadd.f32 %v484_v54, %v483_v51 }
 0x154   : > { %937 = shalt.err (!%p934_p7)
}
 0x155   : > { %s938_s30 = scalar_lea.hbm %s1249_s5, 512  ;;  %s942_s10 = scalar_lea.hbm %s1350_s2, 1024 }
 0x156   : > { %p939_p9 = scmp.ne.s32.totalorder %s1249_s5, %s938_s30  ;;  %p943_p5 = scmp.lt.u32.totalorder %s1249_s5, %s1350_s2 }
 0x157   : > { %p944_p11 = scmp.lt.u32.totalorder %s942_s10, %s938_s30  ;;  %p946_p4 = scmp.lt.u32.totalorder %s938_s30, %s1249_s5 }
 0x158   : > { %p940_p1 = pnand %p939_p9, %p1151_p12 }
 0x159   : > { %p945_p2 = por %p944_p11, %p943_p5 }
 0x15a   : > { %p941_p0 = pneg %p940_p1 }
 0x15b   : > { %p947_p6 = por %p946_p4, %p945_p2 }
 0x15d   : > { %p948_p8 = pnand %p947_p6, %p941_p0 }
 0x15f   : > { %951 = shalt.err (!%p948_p8)
}
 0x160   : > { %s1034_s20 = smov 64   ;;  %s1035_s9 = smov 4   ;;  %v693_v60 = vsel %vm444_vm6, 1.0, %v1032_v26  ;;  %v486_v61 = vmul.f32 %v766_v38, %v465_v52  ;;  %v492_v62 = vadd.f32 %v491_v58, %v485_v56  ;;  %v472_v63 = vadd.f32 %v471_v57, %v465_v52 }
 0x161   : > { %793 = dma.vmem_to_hbm [thread:$0]  (%p1151_p12), %s1242_s8, 512, %s1249_s5, %s508_s11, %s1034_s20, %s1034_s20, %s1035_s9   ;;  %v467_v0 = vmul.f32 %v692_v55, %v1244_v44  ;;  %v694_v1 = vsel %vm445_vm7, 1.0, %v1032_v26  ;;  %v468_v2 = vmul.f32 %v1229_v30, %v693_v60  ;;  %v487_v4 = vmul.f32 %v466_v59, %v1235_v36 }
 0x162   : > { %v473_v3 = vadd.f32 %v472_v63, %v466_v59  ;;  %v493_v5 = vadd.f32 %v492_v62, %v486_v61  ;;  %v469_v7 = vmul.f32 %v1238_v39, %v694_v1  ;;  %s665_s8 = sshll.u32 %s1202_s6, 1  ;;  %s699_s4 = sshll.u32 %s1078_s16, 5  ;;  %vm504_vm8 = vcmask 1040384  }
 0x163   : > { %v488_v9 = vmul.f32 %v467_v0, %v1244_v44  ;;  %v489_v10 = vmul.f32 %v1229_v30, %v468_v2  ;;  %s214_s25 = scalar_lea.vmem [#allocation8], %s665_s8  ;;  %s1304_s28 = scalar_lea.hbm %s1351_s3, %s699_s4 }
 0x164   : > { %v494_v6 = vadd.f32 %v493_v5, %v487_v4  ;;  %v474_v8 = vadd.f32 %v473_v3, %v467_v0  ;;  %v490_v13 = vmul.f32 %v1238_v39, %v469_v7  ;;  %s542_s5 = sshll.u32 %s214_s25, 4  ;;  %s513_s23 = scalar_lea.sflag [#allocation9], %s1202_s6  ;;  %s1306_s5 = int_to_ptr.vmem [resolvable:$true] %s542_s5 }
 0x165   : > { %s952_s29 = scalar_lea.vmem %s1306_s5, 32  ;;  %s1036_s16 = smov [#allocation8]  }
 0x166   : > { %v475_v11 = vadd.f32 %v474_v8, %v468_v2  ;;  %v495_v12 = vadd.f32 %v494_v6, %v488_v9  ;;  %p953_p10 = scmp.ne.s32.totalorder %s1306_s5, %s952_s29  ;;  %s956_s30 = sshll.u32 %s1036_s16, 4  ;;  %s957_s30 = int_to_ptr.vmem [resolvable:$false] %s956_s30 }
 0x167   : > { %s958_s22 = scalar_lea.vmem %s957_s30, 64  ;;  %p959_p7 = scmp.lt.s32.totalorder %s1306_s5, %s957_s30 }
 0x168   : > { %v476_v14 = vadd.f32 %v475_v11, %v469_v7  ;;  %v496_v15 = vadd.f32 %v495_v12, %v489_v10  ;;  %p954_p13 = pnand %p953_p10, %p1151_p12  ;;  %p960_p9 = scmp.lt.s32.totalorder %s958_s22, %s952_s29 }
 0x16a   : > { %v477_v16 = vrot.slane %v476_v14, 4  ;;  %v497_v17 = vadd.f32 %v496_v15, %v490_v13  ;;  %p955_p3 = pneg %p954_p13  ;;  %p961_p1 = por %p960_p9, %p959_p7 }
 0x16c   : > { %v478_v18 = vadd.f32 %v477_v16, %v476_v14  ;;  %v498_v19 = vrot.slane %v497_v17, 4  ;;  %p962_p0 = pnand %p961_p1, %p955_p3 }
 0x16e   : > { %v479_v20 = vrot.slane %v478_v18, 2  ;;  %v499_v21 = vadd.f32 %v498_v19, %v497_v17 }
 0x170   : > { %v480_v22 = vadd.f32 %v479_v20, %v478_v18  ;;  %v500_v23 = vrot.slane %v499_v21, 2 }
 0x172   : > { %v481_v24 = vrot.slane %v480_v22, 1  ;;  %v501_v25 = vadd.f32 %v500_v23, %v499_v21 }
 0x174   : > { %v502_v26 = vrot.slane %v501_v25, 1  ;;  %v482_v27 = vadd.f32 %v481_v24, %v480_v22 }
 0x176   : > { %v503_v28 = vadd.f32 %v502_v26, %v501_v25 }
 0x178   : > { %v505_v29 = vsel %vm504_vm8, %v482_v27, %v503_v28 }
 0x179   : > { %506 = vst [vmem:[%s214_s25] sm:$0x3] %v505_v29 }
 0x17a   : > { %965 = shalt.err (!%p962_p0)
}
 0x17b   : > { %s966_s6 = scalar_lea.hbm %s1304_s28, 32  ;;  %s970_s26 = scalar_lea.hbm %s1351_s3, 64 }
 0x17c   : > { %p967_p5 = scmp.ne.s32.totalorder %s1304_s28, %s966_s6  ;;  %p971_p4 = scmp.lt.u32.totalorder %s1304_s28, %s1351_s3 }
 0x17d   : > { %p972_p6 = scmp.lt.u32.totalorder %s970_s26, %s966_s6  ;;  %p974_p10 = scmp.lt.u32.totalorder %s966_s6, %s1304_s28 }
 0x17e   : > { %p968_p11 = pnand %p967_p5, %p1151_p12 }
 0x17f   : > { %p973_p8 = por %p972_p6, %p971_p4 }
 0x180   : > { %p969_p2 = pneg %p968_p11 }
 0x181   : > { %p975_p13 = por %p974_p10, %p973_p8 }
 0x183   : > { %p976_p3 = pnand %p975_p13, %p969_p2 }
 0x185   : > { %979 = shalt.err (!%p976_p3)
}
 0x186   : > { %794 = dma.vmem_to_hbm [thread:$0]  (%p1151_p12), %s1306_s5, 32, %s1304_s28, %s513_s23  }
 0x187 PF: > { %s554_s9 = sand.u32 1, %s1014_s12   ;;  %p1366_p7 = scmp.ne.s32.totalorder %s1356_s19, 0 }
 0x188   : > { %p1367_p9 = scmp.ge.s32.totalorder %s1026_s15, 2  ;;  %s555_s8 = scalar_lea.sflag [#allocation4], %s554_s9 }
 0x18a   : > { %p806_p1 = pnand %p1367_p9, %p1366_p7 }
 0x18c   : > { %1005 = dma.done.wait (!%p806_p1), %s555_s8, 512  }
 0x18d   : > { %1007 = vsyncadd (!%p806_p1), %s555_s8, 4294966784  ;;  %s564_s4 = scalar_lea.sflag [#allocation9], %s554_s9 }
 0x18e   : > { %1009 = dma.done.wait (!%p806_p1), %s564_s4, 32  }
 0x18f   : > { %1011 = vsyncadd (!%p806_p1), %s564_s4, 4294967264  ;;  %p21_p12 = scmp.ge.s32.totalorder %s1113_s24, 4   ;;  %s1368_s12 = smov %s1018_s13 }
 0x190   : > { %s1369_s13 = smov %s1022_s14  ;;  %s1370_s14 = smov %s1147_s17 }
 0x191   : > { %s1371_s15 = smov %s1113_s24  ;;  %23 = sbr.rel (!%p21_p12) target bundleno = 8 (0x8), region = 94 }
 0x198   :  { %569 = vsyncpa [#allocation3], 1 }
 0x199   :  { %571 = vsyncpa [#allocation3 + $0x1], 1 }
 0x19a   :  { %572 = vsyncpa [#allocation6], 1 }
 0x19b   :  { %573 = vsyncpa [#allocation4], 1 }
 0x19c   :  { %575 = vsyncpa [#allocation4 + $0x1], 1 }
 0x19d   :  { %576 = vsyncpa [#allocation9], 1 }
 0x19e   :  { %578 = vsyncpa [#allocation9 + $0x1], 1 }

</bundles_post_ra>
